<compile_context>
chip_gen: v6e
topology: v6e:2x2x1
jax: 0.10.0
libtpu: 0.0.40
codegen_flags: <defaults>
</compile_context>

<pallas_src>
import functools

import jax
import jax.numpy as jnp
from jax.experimental import pallas as pl
from jax.experimental.pallas import tpu as pltpu


def _round_up(v, m):
    return ((v + m - 1) // m) * m


# ---------------------------------------------------------------------------
# Pass 1: per-batch patch statistics (no conv output written at all).
#   input : patches block (1, Kd_pad, tl)  bf16
#   outputs (revisited across the L_out-tile axis, one block per batch index):
#     s_ref (1, Kd_pad, 1)       f32   column sum  sum_t P[:, t]
#     g_ref (1, Kd_pad, Kd_pad)  f32   Gram        sum_t P[:, t] P[:, t]^T
#   Padded L_out columns / padded Kd rows are zero -> contribute exactly 0.
# ---------------------------------------------------------------------------
def _patch_stats_kernel(p_ref, s_ref, g_ref):
    @pl.when(pl.program_id(1) == 0)
    def _():
        s_ref[...] = jnp.zeros_like(s_ref)
        g_ref[...] = jnp.zeros_like(g_ref)

    p = p_ref[0]                                             # (Kd_pad, tl) bf16
    s_ref[...] += jnp.sum(p.astype(jnp.float32), axis=1, keepdims=True)[None]
    g = jax.lax.dot_general(p, p, (((1,), (1,)), ((), ())),
                            preferred_element_type=jnp.float32)
    g_ref[...] += g[None]


# ---------------------------------------------------------------------------
# Pass 2: fused conv (MXU) + BatchNorm scale/shift + ReLU, lane-dense output.
# ---------------------------------------------------------------------------
def _conv_bn_relu_kernel(p_ref, w_ref, scale_ref, shift_ref, y_ref):
    acc = jnp.dot(w_ref[...], p_ref[0],
                  preferred_element_type=jnp.float32)        # (C_out, tl) f32
    y = acc * scale_ref[...] + shift_ref[...]
    y_ref[...] = jnp.maximum(y, 0.0).astype(y_ref.dtype)[None]


def conv1d_block(x, weight, bias, gamma, beta, *, stride, eps=1e-5,
                 mxu_dtype=jnp.bfloat16, tile_l=2048, out_dtype=jnp.float32):
    """Forward of Conv1DBlock (training-mode BatchNorm1d).

    x      : (N, C_in, L)      f32
    weight : (C_out, C_in, K)  f32
    bias   : (C_out,)          f32  (cancelled exactly by BN batch-mean sub)
    gamma  : (C_out,)          f32  (BN weight)
    beta   : (C_out,)          f32  (BN bias)
    returns: (N, C_out, L_out) out_dtype, PyTorch layout (no wrapper transpose)
    """
    del bias  # cancelled by training-mode BN mean subtraction (exact)
    # TODO(synk): re-add the conv bias (and use running stats) for eval-mode BN.

    N, C_in, L = x.shape
    C_out, _, K = weight.shape
    L_out = (L - K) // stride + 1
    assert L_out >= 1

    # Contraction dim, padded for clean bf16 sublane tiling.
    Kd = C_in * K
    Kd_pad = _round_up(Kd, 16 if mxu_dtype == jnp.bfloat16 else 8)

    # --- generation-aware VMEM limit (v7x: 64 MiB physical; v5e/v6e: 128 MiB) --
    try:
        vmem_cap = int(getattr(pltpu.get_tpu_info(), "vmem_capacity_bytes",
                               64 * 1024 * 1024))
    except Exception:
        vmem_cap = 64 * 1024 * 1024
    vmem_limit = int(min(max(vmem_cap * 3 // 4, 32 * 1024 * 1024),
                         96 * 1024 * 1024))

    # --- lane tile over output positions (shrunk if the working set is big) ---
    tl = min(_round_up(max(tile_l, 128), 128), _round_up(L_out, 128))

    def _step_bytes(t):
        return (2 * Kd_pad * t * 2            # double-buffered bf16 patches
                + 2 * C_out * t * 4           # double-buffered output tile
                + 2 * C_out * Kd_pad * 2      # weights
                + 2 * (Kd_pad * Kd_pad + Kd_pad) * 4  # pass-1 stat blocks
                + 4 * C_out * 4)              # scale / shift

    while tl > 128 and _step_bytes(tl) > vmem_limit // 2:
        tl = max(128, _round_up(tl // 2, 128))

    L_pad = _round_up(L_out, tl)
    T = L_pad // tl

    # --- im2col via K static strided slices (no XLA gather) -------------------
    # patches[n, c*K + k, t] = x[n, c, t*stride + k]
    last = (L_out - 1) * stride
    cols = [x[:, :, k:last + k + 1:stride] for k in range(K)]  # K x (N,C_in,L_out)
    patches = jnp.stack(cols, axis=2).reshape(N, Kd, L_out)
    patches = jnp.pad(patches, ((0, 0), (0, Kd_pad - Kd), (0, L_pad - L_out)))
    patches = patches.astype(mxu_dtype)

    w_mat = weight.reshape(C_out, Kd)
    w_mat = jnp.pad(w_mat, ((0, 0), (0, Kd_pad - Kd)))
    w_q = w_mat.astype(mxu_dtype)          # MXU operand for pass 2
    w_f = w_q.astype(jnp.float32)          # same quantized weights for stats

    # --- pass 1: per-batch patch column-sum + Gram accumulation ---------------
    s_n, g_n = pl.pallas_call(
        _patch_stats_kernel,
        grid=(N, T),
        in_specs=[pl.BlockSpec((1, Kd_pad, tl), lambda n, j: (n, 0, j))],
        out_specs=(
            pl.BlockSpec((1, Kd_pad, 1), lambda n, j: (n, 0, 0)),
            pl.BlockSpec((1, Kd_pad, Kd_pad), lambda n, j: (n, 0, 0)),
        ),
        out_shape=(
            jax.ShapeDtypeStruct((N, Kd_pad, 1), jnp.float32),
            jax.ShapeDtypeStruct((N, Kd_pad, Kd_pad), jnp.float32),
        ),
        compiler_params=pltpu.CompilerParams(
            # batch axis parallel (2-TC shardable on v7x); tile axis accumulates
            dimension_semantics=("parallel", "arbitrary"),
            vmem_limit_bytes=vmem_limit,
        ),
    )(patches)

    # --- tiny O(C_out * Kd) wrapper math: batch stats -> affine scale/shift ---
    s = jnp.sum(s_n, axis=0)[:, 0]                     # (Kd_pad,)
    G = jnp.sum(g_n, axis=0)                           # (Kd_pad, Kd_pad)
    count = jnp.float32(N * L_out)                     # true (unpadded) count
    ch_sum = w_f @ s                                   # (C_out,)
    ch_ssq = jnp.sum((w_f @ G) * w_f, axis=1)          # (C_out,)  w_c^T G w_c
    mean = ch_sum / count
    var = jnp.maximum(ch_ssq / count - mean * mean, 0.0)   # guard E[x^2]-E[x]^2
    inv = jax.lax.rsqrt(var + eps)
    scale = (gamma * inv).reshape(C_out, 1)
    shift = (beta - mean * gamma * inv).reshape(C_out, 1)

    # --- pass 2: fused conv + BN + ReLU, fully parallel, lane-dense output ----
    y = pl.pallas_call(
        _conv_bn_relu_kernel,
        grid=(N, T),
        in_specs=[
            pl.BlockSpec((1, Kd_pad, tl), lambda n, j: (n, 0, j)),
            pl.BlockSpec((C_out, Kd_pad), lambda n, j: (0, 0)),
            pl.BlockSpec((C_out, 1), lambda n, j: (0, 0)),
            pl.BlockSpec((C_out, 1), lambda n, j: (0, 0)),
        ],
        out_specs=pl.BlockSpec((1, C_out, tl), lambda n, j: (n, 0, j)),
        # Unpadded output: Pallas clips out-of-bounds writes of the edge tile,
        # so the result is exactly (N, C_out, L_out) in PyTorch layout.
        out_shape=jax.ShapeDtypeStruct((N, C_out, L_out), out_dtype),
        compiler_params=pltpu.CompilerParams(
            dimension_semantics=("parallel", "parallel"),
            vmem_limit_bytes=vmem_limit,
        ),
    )(patches, w_q, scale, shift)

    return y


def _reference(x, weight, bias, gamma, beta, *, stride, eps=1e-5):
    """Pure-JAX f32 reference of Conv1DBlock.forward (training-mode BN)."""
    out = jax.lax.conv_general_dilated(
        x, weight, window_strides=(stride,), padding="VALID",
        dimension_numbers=("NCH", "OIH", "NCH"))
    out = out + bias[None, :, None]
    mean = out.mean(axis=(0, 2), keepdims=True)
    var = ((out - mean) ** 2).mean(axis=(0, 2), keepdims=True)
    y = (out - mean) * jax.lax.rsqrt(var + eps)
    y = y * gamma[None, :, None] + beta[None, :, None]
    return jnp.maximum(y, 0.0)


if __name__ == "__main__":
    def run_case(key, batch, c_in, c_out, length, k, s):
        kx, kw, kb = jax.random.split(key, 3)
        x = jax.random.normal(kx, (batch, c_in, length), dtype=jnp.float32)
        fan_in = c_in * k
        bound = 1.0 / (fan_in ** 0.5)
        weight = jax.random.uniform(
            kw, (c_out, c_in, k), minval=-bound, maxval=bound, dtype=jnp.float32)
        bias = jax.random.uniform(
            kb, (c_out,), minval=-bound, maxval=bound, dtype=jnp.float32)
        # Non-trivial (but deterministic) BN affine params.
        gamma = jnp.linspace(0.5, 1.5, c_out, dtype=jnp.float32)
        beta = jnp.linspace(-0.1, 0.1, c_out, dtype=jnp.float32)

        run = jax.jit(functools.partial(conv1d_block, stride=s))
        out = run(x, weight, bias, gamma, beta)
        jax.block_until_ready(out)

        l_out = (length - k) // s + 1
        assert out.shape == (batch, c_out, l_out), out.shape

        ref = _reference(x, weight, bias, gamma, beta, stride=s)
        err = float(jnp.max(jnp.abs(out - ref)))
        assert bool(jnp.allclose(out, ref, atol=5e-2, rtol=5e-2)), err
        return err

    key = jax.random.PRNGKey(0)
    k1, k2 = jax.random.split(key)
    # CNN1D44k feature extractor shapes (small): Conv1DBlock(1, 16) then (16, 32).
    run_case(k1, 2, 1, 16, 256, 10, 5)
    run_case(k2, 2, 16, 32, 128, 10, 5)
    print("KERNEL_OK")
</pallas_src>

<mosaic_0001>
module attributes {stable_mosaic.version = 11 : i64} {
  func.func @_patch_stats_kernel(%arg0: i32, %arg1: i32, %arg2: memref<1x16x128xbf16, #tpu.memory_space<vmem>>, %arg3: memref<1x16x1xf32, #tpu.memory_space<vmem>>, %arg4: memref<1x16x16xf32, #tpu.memory_space<vmem>>) attributes {dimension_semantics = [#tpu.dimension_semantics<parallel>, #tpu.dimension_semantics<arbitrary>], iteration_bounds = array<i64: 2, 1>, scalar_prefetch = 0 : i64, scratch_operands = 0 : i64, tpu.core_type = #tpu.core_type<tc>, window_params = [{transform_indices = @transform_0, window_bounds = array<i64: 1, 16, 128>}, {transform_indices = @transform_1, window_bounds = array<i64: 1, 16, 1>}, {transform_indices = @transform_2, window_bounds = array<i64: 1, 16, 16>}]} {
    %c0_i32 = arith.constant 0 : i32
    %0 = arith.cmpi eq, %arg1, %c0_i32 : i32
    %1 = arith.extui %0 : i1 to i32
    %c0_i32_0 = arith.constant 0 : i32
    %2 = arith.cmpi ne, %1, %c0_i32_0 : i32
    scf.if %2 {
      %cst_16 = arith.constant 0.000000e+00 : f32
      %17 = vector.broadcast %cst_16 : f32 to vector<1x16x1xf32>
      %c0_17 = arith.constant 0 : index
      %c0_18 = arith.constant 0 : index
      %c0_19 = arith.constant 0 : index
      %18 = vector.load %arg3[%c0_17, %c0_18, %c0_19] : memref<1x16x1xf32, #tpu.memory_space<vmem>>, vector<1x16x1xf32>
      tpu.vector_store %arg3[%c0_17, %c0_18, %c0_19], %17 {strides = array<i32>} : memref<1x16x1xf32, #tpu.memory_space<vmem>>, vector<1x16x1xf32>,
      %cst_20 = arith.constant 0.000000e+00 : f32
      %19 = vector.broadcast %cst_20 : f32 to vector<1x16x16xf32>
      %c0_21 = arith.constant 0 : index
      %c0_22 = arith.constant 0 : index
      %c0_23 = arith.constant 0 : index
      %20 = vector.load %arg4[%c0_21, %c0_22, %c0_23] : memref<1x16x16xf32, #tpu.memory_space<vmem>>, vector<1x16x16xf32>
      tpu.vector_store %arg4[%c0_21, %c0_22, %c0_23], %19 {strides = array<i32>} : memref<1x16x16xf32, #tpu.memory_space<vmem>>, vector<1x16x16xf32>,
    } else {
    }
    %c0 = arith.constant 0 : index
    %c0_1 = arith.constant 0 : index
    %c0_2 = arith.constant 0 : index
    %3 = vector.load %arg2[%c0, %c0_1, %c0_2] : memref<1x16x128xbf16, #tpu.memory_space<vmem>>, vector<1x16x128xbf16>
    %4 = vector.shape_cast %3 : vector<1x16x128xbf16> to vector<16x128xbf16>
    %c0_3 = arith.constant 0 : index
    %c0_4 = arith.constant 0 : index
    %c0_5 = arith.constant 0 : index
    %5 = vector.load %arg3[%c0_3, %c0_4, %c0_5] : memref<1x16x1xf32, #tpu.memory_space<vmem>>, vector<1x16x1xf32>
    %6 = arith.extf %4 : vector<16x128xbf16> to vector<16x128xf32>
    %cst = arith.constant dense<0.000000e+00> : vector<16xf32>
    %7 = vector.multi_reduction <add>, %6, %cst [1] : vector<16x128xf32> to vector<16xf32>
    %8 = vector.shape_cast %7 : vector<16xf32> to vector<16x1xf32>
    %9 = vector.shape_cast %8 : vector<16x1xf32> to vector<1x16x1xf32>
    %10 = arith.addf %5, %9 : vector<1x16x1xf32>
    %c0_6 = arith.constant 0 : index
    %c0_7 = arith.constant 0 : index
    %c0_8 = arith.constant 0 : index
    %11 = vector.load %arg3[%c0_6, %c0_7, %c0_8] : memref<1x16x1xf32, #tpu.memory_space<vmem>>, vector<1x16x1xf32>
    tpu.vector_store %arg3[%c0_6, %c0_7, %c0_8], %10 {strides = array<i32>} : memref<1x16x1xf32, #tpu.memory_space<vmem>>, vector<1x16x1xf32>,
    %cst_9 = arith.constant dense<0.000000e+00> : vector<16x16xf32>
    %12 = tpu.matmul %4, %4, %cst_9 {dimension_numbers = #tpu.dot_dimension_numbers<[1], [1], [0], [0], [0, 0, 1, 0], [], []>} : vector<16x128xbf16>, vector<16x128xbf16>, vector<16x16xf32> -> vector<16x16xf32>
    %c0_10 = arith.constant 0 : index
    %c0_11 = arith.constant 0 : index
    %c0_12 = arith.constant 0 : index
    %13 = vector.load %arg4[%c0_10, %c0_11, %c0_12] : memref<1x16x16xf32, #tpu.memory_space<vmem>>, vector<1x16x16xf32>
    %14 = vector.shape_cast %12 : vector<16x16xf32> to vector<1x16x16xf32>
    %15 = arith.addf %13, %14 : vector<1x16x16xf32>
    %c0_13 = arith.constant 0 : index
    %c0_14 = arith.constant 0 : index
    %c0_15 = arith.constant 0 : index
    %16 = vector.load %arg4[%c0_13, %c0_14, %c0_15] : memref<1x16x16xf32, #tpu.memory_space<vmem>>, vector<1x16x16xf32>
    tpu.vector_store %arg4[%c0_13, %c0_14, %c0_15], %15 {strides = array<i32>} : memref<1x16x16xf32, #tpu.memory_space<vmem>>, vector<1x16x16xf32>,
    return
  }
  func.func @transform_0(%arg0: i32, %arg1: i32) -> (i32, i32, i32) {
    %c0_i32 = arith.constant 0 : i32
    %c0_i32_0 = arith.constant 0 : i32
    return %arg0, %c0_i32, %arg1 : i32, i32, i32
  }
  func.func @transform_1(%arg0: i32, %arg1: i32) -> (i32, i32, i32) {
    %c0_i32 = arith.constant 0 : i32
    %c0_i32_0 = arith.constant 0 : i32
    %c0_i32_1 = arith.constant 0 : i32
    return %arg0, %c0_i32, %c0_i32_0 : i32, i32, i32
  }
  func.func @transform_2(%arg0: i32, %arg1: i32) -> (i32, i32, i32) {
    %c0_i32 = arith.constant 0 : i32
    %c0_i32_0 = arith.constant 0 : i32
    %c0_i32_1 = arith.constant 0 : i32
    return %arg0, %c0_i32, %c0_i32_0 : i32, i32, i32
  }
}

module attributes {stable_mosaic.version = 11 : i64} {
  func.func @_conv_bn_relu_kernel(%arg0: i32, %arg1: i32, %arg2: memref<1x16x128xbf16, #tpu.memory_space<vmem>>, %arg3: memref<16x16xbf16, #tpu.memory_space<vmem>>, %arg4: memref<16x1xf32, #tpu.memory_space<vmem>>, %arg5: memref<16x1xf32, #tpu.memory_space<vmem>>, %arg6: memref<1x16x128xf32, #tpu.memory_space<vmem>>) attributes {dimension_semantics = [#tpu.dimension_semantics<parallel>, #tpu.dimension_semantics<parallel>], iteration_bounds = array<i64: 2, 1>, scalar_prefetch = 0 : i64, scratch_operands = 0 : i64, tpu.core_type = #tpu.core_type<tc>, window_params = [{transform_indices = @transform_0, window_bounds = array<i64: 1, 16, 128>}, {pipeline_mode = #tpu.pipeline_mode<synchronous>, transform_indices = @transform_1, window_bounds = array<i64: 16, 16>}, {pipeline_mode = #tpu.pipeline_mode<synchronous>, transform_indices = @transform_2, window_bounds = array<i64: 16, 1>}, {pipeline_mode = #tpu.pipeline_mode<synchronous>, transform_indices = @transform_3, window_bounds = array<i64: 16, 1>}, {transform_indices = @transform_4, window_bounds = array<i64: 1, 16, 128>}]} {
    %c0 = arith.constant 0 : index
    %c0_0 = arith.constant 0 : index
    %0 = vector.load %arg3[%c0, %c0_0] : memref<16x16xbf16, #tpu.memory_space<vmem>>, vector<16x16xbf16>
    %c0_1 = arith.constant 0 : index
    %c0_2 = arith.constant 0 : index
    %c0_3 = arith.constant 0 : index
    %1 = vector.load %arg2[%c0_1, %c0_2, %c0_3] : memref<1x16x128xbf16, #tpu.memory_space<vmem>>, vector<1x16x128xbf16>
    %2 = vector.shape_cast %1 : vector<1x16x128xbf16> to vector<16x128xbf16>
    %cst = arith.constant dense<0.000000e+00> : vector<16x128xf32>
    %3 = tpu.matmul %0, %2, %cst {dimension_numbers = #tpu.dot_dimension_numbers<[1], [0], [0], [1], [0, 0, 1, 1], [], []>} : vector<16x16xbf16>, vector<16x128xbf16>, vector<16x128xf32> -> vector<16x128xf32>
    %c0_4 = arith.constant 0 : index
    %c0_5 = arith.constant 0 : index
    %4 = vector.load %arg4[%c0_4, %c0_5] : memref<16x1xf32, #tpu.memory_space<vmem>>, vector<16x1xf32>
    %5 = vector.broadcast %4 : vector<16x1xf32> to vector<16x128xf32>
    %6 = arith.mulf %3, %5 : vector<16x128xf32>
    %c0_6 = arith.constant 0 : index
    %c0_7 = arith.constant 0 : index
    %7 = vector.load %arg5[%c0_6, %c0_7] : memref<16x1xf32, #tpu.memory_space<vmem>>, vector<16x1xf32>
    %8 = vector.broadcast %7 : vector<16x1xf32> to vector<16x128xf32>
    %9 = arith.addf %6, %8 : vector<16x128xf32>
    %cst_8 = arith.constant 0.000000e+00 : f32
    %10 = vector.broadcast %cst_8 : f32 to vector<16x128xf32>
    %11 = arith.maximumf %9, %10 : vector<16x128xf32>
    %12 = vector.shape_cast %11 : vector<16x128xf32> to vector<1x16x128xf32>
    %c0_9 = arith.constant 0 : index
    %c0_10 = arith.constant 0 : index
    %c0_11 = arith.constant 0 : index
    %13 = vector.load %arg6[%c0_9, %c0_10, %c0_11] : memref<1x16x128xf32, #tpu.memory_space<vmem>>, vector<1x16x128xf32>
    tpu.vector_store %arg6[%c0_9, %c0_10, %c0_11], %12 {strides = array<i32>} : memref<1x16x128xf32, #tpu.memory_space<vmem>>, vector<1x16x128xf32>,
    return
  }
  func.func @transform_0(%arg0: i32, %arg1: i32) -> (i32, i32, i32) {
    %c0_i32 = arith.constant 0 : i32
    %c0_i32_0 = arith.constant 0 : i32
    return %arg0, %c0_i32, %arg1 : i32, i32, i32
  }
  func.func @transform_1(%arg0: i32, %arg1: i32) -> (i32, i32) {
    %c0_i32 = arith.constant 0 : i32
    %c0_i32_0 = arith.constant 0 : i32
    %c0_i32_1 = arith.constant 0 : i32
    return %c0_i32, %c0_i32_0 : i32, i32
  }
  func.func @transform_2(%arg0: i32, %arg1: i32) -> (i32, i32) {
    %c0_i32 = arith.constant 0 : i32
    %c0_i32_0 = arith.constant 0 : i32
    %c0_i32_1 = arith.constant 0 : i32
    return %c0_i32, %c0_i32_0 : i32, i32
  }
  func.func @transform_3(%arg0: i32, %arg1: i32) -> (i32, i32) {
    %c0_i32 = arith.constant 0 : i32
    %c0_i32_0 = arith.constant 0 : i32
    %c0_i32_1 = arith.constant 0 : i32
    return %c0_i32, %c0_i32_0 : i32, i32
  }
  func.func @transform_4(%arg0: i32, %arg1: i32) -> (i32, i32, i32) {
    %c0_i32 = arith.constant 0 : i32
    %c0_i32_0 = arith.constant 0 : i32
    return %arg0, %c0_i32, %arg1 : i32, i32, i32
  }
}

</mosaic_0001>

<bundles_post_ra>
// kernel: conv1d_block.3
= control target key start
LH: loop header
LB: loop body
LE: loop exit
PB: predicated region body
PF: predicated region fallthrough
CT: control target
= control target key end

     0   :  { %9 = vsyncpa [#allocation3], 0  ;;  %s735_s0 = inlined_call_operand.vmem [shape: bf16[2,16,128], index: 0, kind: input, shape index: {}]   ;;  %s736_s1 = inlined_call_operand.vmem [shape: bf16[16,16], index: 1, kind: input, shape index: {}]   ;;  %s737_s2 = inlined_call_operand.vmem [shape: f32[16,1], index: 2, kind: input, shape index: {}]   ;;  %s738_s3 = inlined_call_operand.vmem [shape: f32[16,1], index: 3, kind: input, shape index: {}]   ;;  %s739_s4 = inlined_call_operand.hbm [shape: f32[2,16,50], index: 4, kind: output, shape index: {}]  }
   0x1   :  { %11 = vsyncpa [#allocation3 + $0x1], 0  ;;  %s606_s15 = smov 0   ;;  %s608_s16 = smov 0  }
   0x2   :  { %s610_s17 = smov 0   ;;  %s612_s18 = smov 0  }
   0x3   :  { %s614_s19 = smov 0   ;;  %s616_s20 = smov 0  }
   0x4 LB: > { %s407_s21 = sadd.s32 4294967295, %s573_s20   ;;  %s408_s22 = sadd.s32 4294967294, %s573_s20   ;;  %s573_s20 = sphi %s616_s20, %s17_s20   ;;  %s569_s19 = sphi %s614_s19, %s746_s19   ;;  %s565_s18 = sphi %s612_s18, %s745_s18   ;;  %s561_s17 = sphi %s610_s17, %s744_s17   ;;  %s557_s16 = sphi %s608_s16, %s743_s16   ;;  %s553_s15 = sphi %s606_s15, %s742_s15  }
   0x5   : > { %s29_s23 = sadd.s32 1, %s569_s19  ;;  %s129_s24 = sadd.s32 1, %s561_s17 }
   0x6   : > { %p31_p0 = scmp.ge.s32.totalorder %s29_s23, 2  ;;  %p139_p1 = scmp.ne.s32.totalorder %s561_s17, %s557_s16 }
   0x7   : > { %p140_p2 = scmp.eq.s32.totalorder %s407_s21, 1  ;;  %p145_p3 = scmp.ne.s32.totalorder %s557_s16, %s553_s15 }
   0x8   : > { %s748_s23 = smov (%p31_p0, %s29_s23), 0  ;;  %p146_p5 = scmp.eq.s32.totalorder %s408_s22, 1 }
   0x9   : > { %p646_p4 = por %p140_p2, %p139_p1  ;;  %s124_s26 = ssub.s32 %s569_s19, %s748_s23 }
   0xa   : > { %p411_p6 = scmp.ge.s32.totalorder %s573_s20, 1  ;;  %p127_p7 = scmp.eq.s32.totalorder %s124_s26, 0 }
   0xb   : > { %p653_p8 = por %p146_p5, %p145_p3  ;;  %p184_p9 = scmp.lt.s32.totalorder %s573_s20, 3 }
   0xc   : > { %s659_s28 = scalar_select %p127_p7, %s561_s17, %s129_s24  }
   0xd   : > { %p185_p10 = pnand %p411_p6, %p184_p9 }
   0xe   : > { %p213_p11 = scmp.lt.s32.totalorder (!%p185_p10), %s565_s18, 1  ;;  %s210_s26 = sand.u32 (!%p185_p10), 1, %s557_s16  }
   0xf   : > { %188 = sbr.rel (%p185_p10) target bundleno = 245 (0xf5), region = 36  ;;  %s412_s29 = sshll.u32 (!%p185_p10), %s210_s26, 4 }
  0x10   : > { %s212_s30 = scalar_lea.vmem (!%p185_p10), [#allocation2], %s412_s29  ;;  %s424_s6 = sshll.u32 (!%p185_p10), %s565_s18, 8 }
  0x11   : > { %s329_s5 = sshll.u32 (!%p185_p10), %s212_s30, 4  ;;  %s688_s9 = scalar_lea.hbm (!%p185_p10), %s739_s4, %s424_s6  ;;  %s683_s5 = int_to_ptr.vmem [resolvable:$true] %s329_s5 }
  0x12   : > { %s690_s10 = scalar_lea.sflag (!%p185_p10), [#allocation3], %s210_s26  ;;  %s497_s11 = scalar_lea.vmem (!%p185_p10), %s683_s5, 256 }
  0x13   : > { %p498_p12 = scmp.ne.s32.totalorder (!%p185_p10), %s683_s5, %s497_s11 }
  0x14   : > { %v575_v0 = vmov 0.0   ;;  %vm576_vm0 = vmmov 0   ;;  %v282_v1 = vld [vmem:[%s737_s2] sm:$0xff]  ;;  %s214_s7 = scalar_select %p213_p11, %s565_s18, 1  ;;  %v577_v3 = vmov 0   ;;  %v283_v4 = vld [vmem:[%s737_s2 + $0x8] sm:$0xff] }
  0x15   : > { %427 = vmatprep.subr.bf16.mxu0 %v575_v0  ;;  %429 = vmatprep.mubr.msk.bf16.mxu0 %vm576_vm0, %v575_v0  ;;  %v296_v2 = vld [vmem:[%s738_s3] sm:$0xff]  ;;  %v297_v5 = vld [vmem:[%s738_s3 + $0x8] sm:$0xff]  ;;  %vm237_vm1 = vcmask 130048   ;;  %p499_p13 = pnand %p498_p12, %p646_p4  ;;  %s578_s18 = smov [#allocation2]  }
  0x16   : > { %493 = vset.pattern.permute.xlu0 %v577_v3  ;;  %494 = vset.pattern.permute.xlu1 %v577_v3  ;;  %s423_s8 = sshll.u32 %s214_s7, 3  ;;  %v496_v7 = vld [vmem:[%s736_s1] sm:$0xff]   ;;  %s501_s12 = sshll.u32 %s578_s18, 4  ;;  %s502_s12 = int_to_ptr.vmem [resolvable:$false] %s501_s12 }
  0x17   : > { %286 = vperm.xlu0 %493, %v282_v1   ;;  %300 = vperm.xlu1 %494, %v296_v2   ;;  %s220_s21 = scalar_lea.vmem %s735_s0, %s423_s8  ;;  %p500_p0 = pneg %p499_p13 }
  0x18   : > { %v495_v6 = vld [vmem:[%s220_s21] sm:$0xff]   ;;  %s503_s13 = scalar_lea.vmem %s502_s12, 512  ;;  %p504_p1 = scmp.lt.s32.totalorder %s683_s5, %s502_s12 }
  0x19   : > { %428 = vmatpush3.bf16.msra.mxu0 %v495_v6  ;;  %p505_p2 = scmp.lt.s32.totalorder %s503_s13, %s497_s11 }
  0x1b   : > { %291 = vperm.xlu0 %493, %v283_v4   ;;  %305 = vperm.xlu1 %494, %v297_v5   ;;  %p506_p3 = por %p505_p2, %p504_p1 }
  0x1c   : > { %430 = vmatmul.mubr.msk.bf16.vlgmr.msra.gmra.mxu0 %vm237_vm1, %v496_v7 }
  0x1d   : > { %p507_p5 = pnand %p506_p3, %p500_p0 }
  0x92   : > { %v287_v8 = vpop.permute.xlu0 %286  ;;  %v301_v9 = vpop.permute.xlu1 %300 }
  0x96   : > { %v292_v14 = vpop.permute.xlu0 %291  ;;  %v306_v18 = vpop.permute.xlu1 %305 }
  0xdc   : > { %v275_v10 = vpop.f32.mrf.mxu0 }
  0xdd   : > { %v294_v11 = vmul.f32 %v287_v8, %v275_v10 }
  0xde   : > { %v431_v12 = vpop.f32.mrf.mxu0 }
  0xdf   : > { %v308_v13 = vadd.f32 %v301_v9, %v294_v11 }
  0xe0   : > { %v278_v15 = vpop.f32.mrf.mxu0 }
  0xe1   : > { %v310_v16 = vmax.f32 %v308_v13, 0.0  ;;  %v295_v17 = vmul.f32 %v292_v14, %v278_v15 }
  0xe2   : > { %v432_v19 = vpop.f32.mrf.mxu0 }
  0xe3   : > { %312 = vst [vmem:[%s212_s30] sm:$0xff] %v310_v16  ;;  %v309_v20 = vadd.f32 %v306_v18, %v295_v17 }
  0xe5   : > { %v311_v21 = vmax.f32 %v309_v20, 0.0 }
  0xe7   : > { %313 = vst [vmem:[%s212_s30 + $0x8] sm:$0xff] %v311_v21 }
  0xe8   : > { %510 = shalt.err (!%p507_p5)
}
  0xe9   : > { %s511_s14 = scalar_lea.hbm %s688_s9, 256  ;;  %s515_s24 = scalar_lea.hbm %s739_s4, 512 }
  0xea   : > { %p512_p6 = scmp.ne.s32.totalorder %s688_s9, %s511_s14  ;;  %p516_p10 = scmp.lt.s32.totalorder %s688_s9, %s739_s4 }
  0xeb   : > { %p517_p11 = scmp.lt.s32.totalorder %s515_s24, %s511_s14 }
  0xec   : > { %p513_p7 = pnand %p512_p6, %p646_p4 }
  0xed   : > { %p518_p12 = por %p517_p11, %p516_p10 }
  0xee   : > { %p514_p9 = pneg %p513_p7 }
  0xf0   : > { %p519_p13 = pnand %p518_p12, %p514_p9 }
  0xf2   : > { %522 = shalt.err (!%p519_p13)
}
  0xf3   : > { %s579_s30 = smov 128   ;;  %s580_s6 = smov 8  }
  0xf4   : > { %433 = dma.vmem_to_hbm [thread:$0]  (%p646_p4), %s683_s5, 256, %s688_s9, %s690_s10, %s579_s30, %s579_s30, %s580_s6  }
  0xf5 PF: > { %p439_p0 = scmp.ge.s32.totalorder %s573_s20, 2  ;;  %s344_s7 = sand.u32 1, %s553_s15  }
  0xf6   : > { %s345_s8 = scalar_lea.sflag [#allocation3], %s344_s7 }
  0xf7   : > { %p436_p1 = pnand %p439_p0, %p653_p8 }
  0xf9   : > { %p437_p2 = pneg %p436_p1 }
  0xfb   : > { %548 = dma.done.wait (%p437_p2), %s345_s8, 256  }
  0xfc   : > { %550 = vsyncadd (%p437_p2), %s345_s8, 4294967040  ;;  %s17_s20 = sadd.s32 1, %s573_s20   ;;  %s742_s15 = smov %s557_s16 }
  0xfd   : > { %p14_p3 = scmp.ge.s32.totalorder %s17_s20, 4   ;;  %s743_s16 = smov %s561_s17 }
  0xfe   : > { %s744_s17 = smov %s659_s28  ;;  %s745_s18 = smov %s569_s19 }
  0xff   : > { %s746_s19 = smov %s748_s23  ;;  %16 = sbr.rel (!%p14_p3) target bundleno = 4 (0x4), region = 71 }
 0x104   :  { %350 = vsyncpa [#allocation3], 1 }
 0x105   :  { %352 = vsyncpa [#allocation3 + $0x1], 1 }

// kernel: conv1d_block.2
= control target key start
LH: loop header
LB: loop body
LE: loop exit
PB: predicated region body
PF: predicated region fallthrough
CT: control target
= control target key end

     0   :  { %s456_s9 = smov 0   ;;  %s458_s10 = smov 0   ;;  %s504_s0 = inlined_call_operand.vmem [shape: bf16[2,16,128], index: 0, kind: input, shape index: {}]   ;;  %s505_s1 = inlined_call_operand.vmem [shape: f32[2,16,1], index: 1, kind: output, shape index: {0}]   ;;  %s506_s2 = inlined_call_operand.vmem [shape: f32[2,16,16], index: 2, kind: output, shape index: {1}]  }
   0x1   :  { %s460_s11 = smov 0  }
   0x2 LB: > { %s25_s12 = sadd.s32 1, %s433_s10  ;;  %p366_p0 = scmp.ge.s32.totalorder %s437_s11, 1  ;;  %s437_s11 = sphi %s460_s11, %s13_s11   ;;  %s433_s10 = sphi %s458_s10, %s508_s10   ;;  %s429_s9 = sphi %s456_s9, %s507_s9  }
   0x3   : > { %p27_p1 = scmp.ge.s32.totalorder %s25_s12, 2  ;;  %p132_p2 = scmp.lt.s32.totalorder %s437_s11, 3 }
   0x5   : > { %s510_s12 = smov (%p27_p1, %s25_s12), 0  ;;  %p133_p3 = pnand %p366_p0, %p132_p2 }
   0x6   : > { %p162_p4 = scmp.lt.s32.totalorder (!%p133_p3), %s429_s9, 1 }
   0x7   : > { %136 = sbr.rel (%p133_p3) target bundleno = 223 (0xdf), region = 24 }
   0xc   : > { %v439_v0 = vmov 0.0   ;;  %vm440_vm0 = vmmov 0   ;;  %s512_s9 = smov (!%p162_p4, %s429_s9), 1  ;;  %vm188_vm1 = vcmask 130048   ;;  %vm185_vm2 = vcmask 7168  }
   0xd   : > { %381 = vmatprep.subr.bf16.mxu0 %v439_v0  ;;  %383 = vmatprep.mubr.msk.bf16.mxu0 %vm440_vm0, %v439_v0  ;;  %s376_s13 = sshll.u32 %s512_s9, 3  ;;  %s377_s14 = sshll.u32 %s512_s9, 4 }
   0xe   : > { %s169_s17 = scalar_lea.vmem %s504_s0, %s376_s13  ;;  %s480_s20 = scalar_lea.vmem %s506_s2, %s377_s14 }
   0xf   : > { %v191_v1 = vld [vmem:[%s169_s17] sm:$0xff]   ;;  %189 = vst.msk [vmem:[%s480_s20] sm:$0xff] %vm188_vm1, %v439_v0  ;;  %190 = vst.msk [vmem:[%s480_s20 + $0x8] sm:$0xff] %vm188_vm1, %v439_v0  ;;  %s174_s23 = scalar_lea.vmem %s505_s1, %s377_s14 }
  0x10   : > { %v195_v2 = vunpack.c.l.bf16 %v191_v1  ;;  %382 = vmatpush3.bf16.xpose.msra.mxu0 %v191_v1  ;;  %v196_v3 = vunpack.c.h.bf16 %v191_v1  ;;  %186 = vst.msk [vmem:[%s174_s23] sm:$0xff] %vm185_vm2, %v439_v0  ;;  %187 = vst.msk [vmem:[%s174_s23 + $0x8] sm:$0xff] %vm185_vm2, %v439_v0 }
  0x12   : > { %197 = vadd.xlane.f32.xlu0 %v195_v2 }
  0x16   : > { %199 = vadd.xlane.f32.xlu0 %v196_v3  ;;  %v253_v10 = vld [vmem:[%s480_s20] sm:$0xff]  ;;  %v254_v14 = vld [vmem:[%s480_s20 + $0x8] sm:$0xff] }
  0x17   : > { %384 = vmatmul.mubr.bf16.vlgmr.msra.gmra.mxu0 %v191_v1  ;;  %v193_v4 = vld [vmem:[%s174_s23] sm:$0xff]  ;;  %v194_v7 = vld [vmem:[%s174_s23 + $0x8] sm:$0xff] }
  0x9b   : > { %v198_v5 = vpop.xlane.xlu0 %197 }
  0x9c   : > { %v201_v6 = vadd.f32 %v198_v5, %v193_v4 }
  0x9e   : > { %204 = vst.msk [vmem:[%s174_s23] sm:$0xff] %vm185_vm2, %v201_v6 }
  0x9f   : > { %v200_v8 = vpop.xlane.xlu0 %199 }
  0xa0   : > { %v202_v9 = vadd.f32 %v200_v8, %v194_v7 }
  0xa2   : > { %205 = vst.msk [vmem:[%s174_s23 + $0x8] sm:$0xff] %vm185_vm2, %v202_v9 }
  0xd7   : > { %v246_v11 = vpop.f32.mrf.mxu0 }
  0xd8   : > { %v255_v12 = vadd.f32 %v253_v10, %v246_v11 }
  0xd9   : > { %v385_v13 = vpop.f32.mrf.mxu0 }
  0xda   : > { %258 = vst.msk [vmem:[%s480_s20] sm:$0xff] %vm188_vm1, %v255_v12 }
  0xdb   : > { %v249_v15 = vpop.f32.mrf.mxu0 }
  0xdc   : > { %v256_v16 = vadd.f32 %v254_v14, %v249_v15 }
  0xdd   : > { %v386_v17 = vpop.f32.mrf.mxu0 }
  0xde   : > { %259 = vst.msk [vmem:[%s480_s20 + $0x8] sm:$0xff] %vm188_vm1, %v256_v16 }
  0xdf PF: > { %s13_s11 = sadd.s32 1, %s437_s11   ;;  %s507_s9 = smov %s433_s10 }
  0xe0   : > { %p10_p5 = scmp.ge.s32.totalorder %s13_s11, 4   ;;  %s508_s10 = smov %s510_s12 }
  0xe2   :  { %12 = sbr.rel (!%p10_p5) target bundleno = 2 (0x2), region = 70 }

</bundles_post_ra>
